<compile_context>
chip_gen: v6e
topology: v6e:2x2x1
jax: 0.10.0
libtpu: 0.0.40
codegen_flags: <defaults>
</compile_context>

<pallas_src>
import functools

import jax
import jax.numpy as jnp
from jax.experimental import pallas as pl
from jax.experimental.pallas import tpu as pltpu

LEAKY_SLOPE = 0.2
BN_EPS = 1e-5
LANES = 128


def _round_up(a, b):
    return (a + b - 1) // b * b


# ---------------------------------------------------------------------------
# Pass 1: conv-as-matmul tiles + global (shifted) sum / sum-of-squares stats.
# ---------------------------------------------------------------------------
def _conv_stats_kernel(p_ref, w_ref, y_ref, stats_ref, *, m_true, tm):
    i = pl.program_id(0)

    # MXU matmul: bf16 operands, f32 accumulation.
    y = jnp.dot(p_ref[...], w_ref[...], preferred_element_type=jnp.float32)
    y_ref[...] = y

    @pl.when(i == 0)
    def _init():
        stats_ref[...] = jnp.zeros_like(stats_ref)
        # Per-channel shift (first real output row) for numerically stable
        # shifted-moment accumulation across tiles.
        stats_ref[0:1, :] = y[0:1, :]

    shift = stats_ref[0:1, :]
    # Mask rows that are only M-padding so they do not pollute the BN stats.
    rows = jax.lax.broadcasted_iota(jnp.int32, (tm, 1), 0) + i * tm
    d = jnp.where(rows < m_true, y - shift, 0.0)
    stats_ref[1:2, :] += jnp.sum(d, axis=0, keepdims=True)       # sum(y - shift)
    stats_ref[2:3, :] += jnp.sum(d * d, axis=0, keepdims=True)   # sum((y - shift)^2)


# ---------------------------------------------------------------------------
# Pass 2: finalize BatchNorm (biased variance, eps inside rsqrt) and apply it.
# ---------------------------------------------------------------------------
def _bn_apply_kernel(y_ref, stats_ref, gamma_ref, beta_ref, o_ref, *, m_true):
    inv_m = 1.0 / float(m_true)
    shift = stats_ref[0:1, :]
    s1 = stats_ref[1:2, :] * inv_m          # E[y - shift]
    s2 = stats_ref[2:3, :] * inv_m          # E[(y - shift)^2]
    mean = shift + s1
    var = s2 - s1 * s1                      # biased variance (training-mode BN)
    scale = jax.lax.rsqrt(var + BN_EPS) * gamma_ref[...]
    o_ref[...] = ((y_ref[...] - mean) * scale + beta_ref[...]).astype(o_ref.dtype)


def _im2col_nchw(x, kh, kw, stride, pad):
    """x: (N, C, H, W) -> patches (N*Ho*Wo, C*kh*kw), Ho, Wo."""
    N, C, H, W = x.shape
    xp = jnp.pad(x, ((0, 0), (0, 0), (pad, pad), (pad, pad)))
    Ho = (H + 2 * pad - kh) // stride + 1
    Wo = (W + 2 * pad - kw) // stride + 1
    cols = []
    for i in range(kh):
        for j in range(kw):
            cols.append(xp[:, :, i:i + stride * Ho:stride, j:j + stride * Wo:stride])
    p = jnp.stack(cols, axis=0).reshape(kh, kw, N, C, Ho, Wo)
    p = p.transpose(2, 4, 5, 3, 0, 1)            # (N, Ho, Wo, C, kh, kw)
    return p.reshape(N * Ho * Wo, C * kh * kw), Ho, Wo


@functools.partial(jax.jit, static_argnames=("stride", "padding", "tm"))
def encoder_block(x, conv_w, gamma, beta, *, stride=2, padding=1, tm=None):
    """x: (N, C_in, H, W) f32; conv_w: (C_out, C_in, kh, kw); gamma/beta: (C_out,)."""
    N, C_in, H, W = x.shape
    C_out, _, kh, kw = conv_w.shape

    # LeakyReLU before im2col (identical result, 4x fewer activated elements).
    xa = jnp.where(x >= 0, x, LEAKY_SLOPE * x)

    patches, Ho, Wo = _im2col_nchw(xa, kh, kw, stride, padding)   # (M, K) f32
    M, K = patches.shape

    Kp = _round_up(K, LANES)                 # lane-dense contraction axis
    Cp = _round_up(C_out, LANES)             # lane-dense output-channel axis
    if tm is None:
        tm = min(512, _round_up(M, 8))       # M tile (rows); multiple of 8 sublanes
    assert tm % 8 == 0
    Mp = _round_up(M, tm)
    n_tiles = Mp // tm

    # bf16 MXU operands (f32 accumulation happens in-kernel), zero-padded.
    p_pad = jnp.zeros((Mp, Kp), jnp.bfloat16).at[:M, :K].set(
        patches.astype(jnp.bfloat16))
    w_pad = jnp.zeros((Kp, Cp), jnp.bfloat16).at[:K, :C_out].set(
        conv_w.reshape(C_out, K).T.astype(jnp.bfloat16))
    g_pad = jnp.zeros((1, Cp), jnp.float32).at[:, :C_out].set(
        gamma.astype(jnp.float32)[None, :])
    b_pad = jnp.zeros((1, Cp), jnp.float32).at[:, :C_out].set(
        beta.astype(jnp.float32)[None, :])

    # Pass 1: conv tiles + resident BN statistic accumulator (axis must be
    # "arbitrary" because the stats output revisits the same block each step).
    y_pad, stats = pl.pallas_call(
        functools.partial(_conv_stats_kernel, m_true=M, tm=tm),
        out_shape=(jax.ShapeDtypeStruct((Mp, Cp), jnp.float32),
                   jax.ShapeDtypeStruct((8, Cp), jnp.float32)),
        grid=(n_tiles,),
        in_specs=[
            pl.BlockSpec((tm, Kp), lambda i: (i, 0)),
            pl.BlockSpec((Kp, Cp), lambda i: (0, 0)),   # weights stay resident
        ],
        out_specs=(
            pl.BlockSpec((tm, Cp), lambda i: (i, 0)),
            pl.BlockSpec((8, Cp), lambda i: (0, 0)),    # resident accumulator
        ),
        compiler_params=pltpu.CompilerParams(
            dimension_semantics=("arbitrary",)),
    )(p_pad, w_pad)

    # Pass 2: independent tiles -> "parallel" (megacore sharding on v7x).
    out_pad = pl.pallas_call(
        functools.partial(_bn_apply_kernel, m_true=M),
        out_shape=jax.ShapeDtypeStruct((Mp, Cp), jnp.float32),
        grid=(n_tiles,),
        in_specs=[
            pl.BlockSpec((tm, Cp), lambda i: (i, 0)),
            pl.BlockSpec((8, Cp), lambda i: (0, 0)),
            pl.BlockSpec((1, Cp), lambda i: (0, 0)),
            pl.BlockSpec((1, Cp), lambda i: (0, 0)),
        ],
        out_specs=pl.BlockSpec((tm, Cp), lambda i: (i, 0)),
        compiler_params=pltpu.CompilerParams(
            dimension_semantics=("parallel",)),
    )(y_pad, stats, g_pad, b_pad)

    # (Mp, Cp) -> strip padding -> (N, Ho, Wo, C_out) -> NCHW.
    return out_pad[:M, :C_out].reshape(N, Ho, Wo, C_out).transpose(0, 3, 1, 2)


def encoder_block_ref(x, conv_w, gamma, beta, *, stride=2, padding=1,
                      matmul_dtype=jnp.float32):
    """Plain-JAX reference (training-mode BatchNorm, biased variance)."""
    xa = jnp.where(x >= 0, x, LEAKY_SLOPE * x)
    y = jax.lax.conv_general_dilated(
        xa.astype(matmul_dtype), conv_w.astype(matmul_dtype),
        window_strides=(stride, stride),
        padding=[(padding, padding), (padding, padding)],
        dimension_numbers=("NCHW", "OIHW", "NCHW"),
        preferred_element_type=jnp.float32)
    mean = y.mean(axis=(0, 2, 3), keepdims=True)
    var = ((y - mean) ** 2).mean(axis=(0, 2, 3), keepdims=True)
    return ((y - mean) * jax.lax.rsqrt(var + BN_EPS)
            * gamma.reshape(1, -1, 1, 1) + beta.reshape(1, -1, 1, 1))


if __name__ == "__main__":
    # Small shapes consistent with EncoderBlock(in_channels=4, out_channels=8)
    N, C_in, H, W = 2, 4, 16, 16
    C_out, kh, kw = 8, 4, 4

    key = jax.random.PRNGKey(0)
    kx, kw_key = jax.random.split(key)
    x = jax.random.normal(kx, (N, C_in, H, W), dtype=jnp.float32)
    conv_w = 0.1 * jax.random.normal(kw_key, (C_out, C_in, kh, kw), dtype=jnp.float32)
    # BatchNorm2d default affine init: weight = 1, bias = 0
    gamma = jnp.ones((C_out,), dtype=jnp.float32)
    beta = jnp.zeros((C_out,), dtype=jnp.float32)

    # tm=64 forces a 2-step M grid at this toy size so the cross-tile BN-stat
    # accumulation path is actually exercised.
    out = encoder_block(x, conv_w, gamma, beta, tm=64)
    out = jax.block_until_ready(out)
    assert out.shape == (N, C_out, H // 2, W // 2), out.shape

    # Apples-to-apples check: reference conv with the same bf16 operands / f32
    # accumulation as the MXU path (tight tolerance).
    ref_bf16 = encoder_block_ref(x, conv_w, gamma, beta, matmul_dtype=jnp.bfloat16)
    err_bf16 = float(jnp.max(jnp.abs(out - ref_bf16)))
    assert jnp.allclose(out, ref_bf16, atol=1e-3, rtol=1e-3), err_bf16

    # Sanity check vs. the full-f32 reference (tolerance sized for bf16 MXU
    # operands with f32 accumulation).
    ref_f32 = encoder_block_ref(x, conv_w, gamma, beta, matmul_dtype=jnp.float32)
    err_f32 = float(jnp.max(jnp.abs(out - ref_f32)))
    assert jnp.allclose(out, ref_f32, atol=5e-2, rtol=5e-2), err_f32

    print("KERNEL_OK")
</pallas_src>

<mosaic_0001>
module attributes {stable_mosaic.version = 11 : i64} {
  func.func @_conv_stats_kernel(%arg0: i32, %arg1: memref<64x128xbf16, #tpu.memory_space<vmem>>, %arg2: memref<128x128xbf16, #tpu.memory_space<vmem>>, %arg3: memref<64x128xf32, #tpu.memory_space<vmem>>, %arg4: memref<8x128xf32, #tpu.memory_space<vmem>>) attributes {dimension_semantics = [#tpu.dimension_semantics<arbitrary>], iteration_bounds = array<i64: 2>, scalar_prefetch = 0 : i64, scratch_operands = 0 : i64, tpu.core_type = #tpu.core_type<tc>, window_params = [{transform_indices = @transform_0, window_bounds = array<i64: 64, 128>}, {pipeline_mode = #tpu.pipeline_mode<synchronous>, transform_indices = @transform_1, window_bounds = array<i64: 128, 128>}, {transform_indices = @transform_2, window_bounds = array<i64: 64, 128>}, {pipeline_mode = #tpu.pipeline_mode<synchronous>, transform_indices = @transform_3, window_bounds = array<i64: 8, 128>}]} {
    %c0 = arith.constant 0 : index
    %c0_0 = arith.constant 0 : index
    %0 = vector.load %arg1[%c0, %c0_0] : memref<64x128xbf16, #tpu.memory_space<vmem>>, vector<64x128xbf16>
    %c0_1 = arith.constant 0 : index
    %c0_2 = arith.constant 0 : index
    %1 = vector.load %arg2[%c0_1, %c0_2] : memref<128x128xbf16, #tpu.memory_space<vmem>>, vector<128x128xbf16>
    %cst = arith.constant dense<0.000000e+00> : vector<64x128xf32>
    %2 = tpu.matmul %0, %1, %cst {dimension_numbers = #tpu.dot_dimension_numbers<[1], [0], [0], [1], [0, 0, 1, 1], [], []>} : vector<64x128xbf16>, vector<128x128xbf16>, vector<64x128xf32> -> vector<64x128xf32>
    %c0_3 = arith.constant 0 : index
    %c0_4 = arith.constant 0 : index
    %3 = vector.load %arg3[%c0_3, %c0_4] : memref<64x128xf32, #tpu.memory_space<vmem>>, vector<64x128xf32>
    tpu.vector_store %arg3[%c0_3, %c0_4], %2 {strides = array<i32>} : memref<64x128xf32, #tpu.memory_space<vmem>>, vector<64x128xf32>,
    %c0_i32 = arith.constant 0 : i32
    %4 = arith.cmpi eq, %arg0, %c0_i32 : i32
    %5 = arith.extui %4 : i1 to i32
    %c0_i32_5 = arith.constant 0 : i32
    %6 = arith.cmpi ne, %5, %c0_i32_5 : i32
    scf.if %6 {
      %cst_17 = arith.constant 0.000000e+00 : f32
      %31 = vector.broadcast %cst_17 : f32 to vector<8x128xf32>
      %c0_18 = arith.constant 0 : index
      %c0_19 = arith.constant 0 : index
      %32 = vector.load %arg4[%c0_18, %c0_19] : memref<8x128xf32, #tpu.memory_space<vmem>>, vector<8x128xf32>
      tpu.vector_store %arg4[%c0_18, %c0_19], %31 {strides = array<i32>} : memref<8x128xf32, #tpu.memory_space<vmem>>, vector<8x128xf32>,
      %33 = vector.extract_strided_slice %2 {offsets = [0, 0], sizes = [1, 128], strides = [1, 1]} : vector<64x128xf32> to vector<1x128xf32>
      %c0_20 = arith.constant 0 : index
      %c0_21 = arith.constant 0 : index
      %34 = vector.load %arg4[%c0_20, %c0_21] : memref<8x128xf32, #tpu.memory_space<vmem>>, vector<1x128xf32>
      tpu.vector_store %arg4[%c0_20, %c0_21], %33 {strides = array<i32>} : memref<8x128xf32, #tpu.memory_space<vmem>>, vector<1x128xf32>,
    } else {
    }
    %c0_6 = arith.constant 0 : index
    %c0_7 = arith.constant 0 : index
    %7 = vector.load %arg4[%c0_6, %c0_7] : memref<8x128xf32, #tpu.memory_space<vmem>>, vector<1x128xf32>
    %8 = tpu.iota {dimensions = array<i32: 0>} : vector<64x1xi32>
    %c64_i32 = arith.constant 64 : i32
    %9 = arith.muli %arg0, %c64_i32 : i32
    %10 = vector.broadcast %9 : i32 to vector<64x1xi32>
    %11 = arith.addi %8, %10 : vector<64x1xi32>
    %c128_i32 = arith.constant 128 : i32
    %12 = vector.broadcast %c128_i32 : i32 to vector<64x1xi32>
    %13 = arith.cmpi slt, %11, %12 : vector<64x1xi32>
    %14 = vector.broadcast %7 : vector<1x128xf32> to vector<64x128xf32>
    %15 = arith.subf %2, %14 : vector<64x128xf32>
    %cst_8 = arith.constant 0.000000e+00 : f32
    %16 = vector.shape_cast %13 : vector<64x1xi1> to vector<64x1xi1>
    %17 = vector.broadcast %16 : vector<64x1xi1> to vector<64x128xi1>
    %18 = vector.broadcast %cst_8 : f32 to vector<64x128xf32>
    %19 = arith.select %17, %15, %18 : vector<64x128xi1>, vector<64x128xf32>
    %c1 = arith.constant 1 : index
    %c0_9 = arith.constant 0 : index
    %20 = vector.load %arg4[%c1, %c0_9] : memref<8x128xf32, #tpu.memory_space<vmem>>, vector<1x128xf32>
    %cst_10 = arith.constant dense<0.000000e+00> : vector<128xf32>
    %21 = vector.multi_reduction <add>, %19, %cst_10 [0] : vector<64x128xf32> to vector<128xf32>
    %22 = vector.shape_cast %21 : vector<128xf32> to vector<1x128xf32>
    %23 = arith.addf %20, %22 : vector<1x128xf32>
    %c1_11 = arith.constant 1 : index
    %c0_12 = arith.constant 0 : index
    %24 = vector.load %arg4[%c1_11, %c0_12] : memref<8x128xf32, #tpu.memory_space<vmem>>, vector<1x128xf32>
    tpu.vector_store %arg4[%c1_11, %c0_12], %23 {strides = array<i32>} : memref<8x128xf32, #tpu.memory_space<vmem>>, vector<1x128xf32>,
    %c2 = arith.constant 2 : index
    %c0_13 = arith.constant 0 : index
    %25 = vector.load %arg4[%c2, %c0_13] : memref<8x128xf32, #tpu.memory_space<vmem>>, vector<1x128xf32>
    %26 = arith.mulf %19, %19 : vector<64x128xf32>
    %cst_14 = arith.constant dense<0.000000e+00> : vector<128xf32>
    %27 = vector.multi_reduction <add>, %26, %cst_14 [0] : vector<64x128xf32> to vector<128xf32>
    %28 = vector.shape_cast %27 : vector<128xf32> to vector<1x128xf32>
    %29 = arith.addf %25, %28 : vector<1x128xf32>
    %c2_15 = arith.constant 2 : index
    %c0_16 = arith.constant 0 : index
    %30 = vector.load %arg4[%c2_15, %c0_16] : memref<8x128xf32, #tpu.memory_space<vmem>>, vector<1x128xf32>
    tpu.vector_store %arg4[%c2_15, %c0_16], %29 {strides = array<i32>} : memref<8x128xf32, #tpu.memory_space<vmem>>, vector<1x128xf32>,
    return
  }
  func.func @transform_0(%arg0: i32) -> (i32, i32) {
    %c0_i32 = arith.constant 0 : i32
    %c0_i32_0 = arith.constant 0 : i32
    return %arg0, %c0_i32 : i32, i32
  }
  func.func @transform_1(%arg0: i32) -> (i32, i32) {
    %c0_i32 = arith.constant 0 : i32
    %c0_i32_0 = arith.constant 0 : i32
    %c0_i32_1 = arith.constant 0 : i32
    return %c0_i32, %c0_i32_0 : i32, i32
  }
  func.func @transform_2(%arg0: i32) -> (i32, i32) {
    %c0_i32 = arith.constant 0 : i32
    %c0_i32_0 = arith.constant 0 : i32
    return %arg0, %c0_i32 : i32, i32
  }
  func.func @transform_3(%arg0: i32) -> (i32, i32) {
    %c0_i32 = arith.constant 0 : i32
    %c0_i32_0 = arith.constant 0 : i32
    %c0_i32_1 = arith.constant 0 : i32
    return %c0_i32, %c0_i32_0 : i32, i32
  }
}

module attributes {stable_mosaic.version = 11 : i64} {
  func.func @_bn_apply_kernel(%arg0: i32, %arg1: memref<64x128xf32, #tpu.memory_space<vmem>>, %arg2: memref<8x128xf32, #tpu.memory_space<vmem>>, %arg3: memref<1x128xf32, #tpu.memory_space<vmem>>, %arg4: memref<1x128xf32, #tpu.memory_space<vmem>>, %arg5: memref<64x128xf32, #tpu.memory_space<vmem>>) attributes {dimension_semantics = [#tpu.dimension_semantics<parallel>], iteration_bounds = array<i64: 2>, scalar_prefetch = 0 : i64, scratch_operands = 0 : i64, tpu.core_type = #tpu.core_type<tc>, window_params = [{transform_indices = @transform_0, window_bounds = array<i64: 64, 128>}, {pipeline_mode = #tpu.pipeline_mode<synchronous>, transform_indices = @transform_1, window_bounds = array<i64: 8, 128>}, {pipeline_mode = #tpu.pipeline_mode<synchronous>, transform_indices = @transform_2, window_bounds = array<i64: 1, 128>}, {pipeline_mode = #tpu.pipeline_mode<synchronous>, transform_indices = @transform_3, window_bounds = array<i64: 1, 128>}, {transform_indices = @transform_4, window_bounds = array<i64: 64, 128>}]} {
    %c0 = arith.constant 0 : index
    %c0_0 = arith.constant 0 : index
    %0 = vector.load %arg2[%c0, %c0_0] : memref<8x128xf32, #tpu.memory_space<vmem>>, vector<1x128xf32>
    %c1 = arith.constant 1 : index
    %c0_1 = arith.constant 0 : index
    %1 = vector.load %arg2[%c1, %c0_1] : memref<8x128xf32, #tpu.memory_space<vmem>>, vector<1x128xf32>
    %cst = arith.constant 7.812500e-03 : f32
    %2 = vector.broadcast %cst : f32 to vector<1x128xf32>
    %3 = arith.mulf %1, %2 : vector<1x128xf32>
    %c2 = arith.constant 2 : index
    %c0_2 = arith.constant 0 : index
    %4 = vector.load %arg2[%c2, %c0_2] : memref<8x128xf32, #tpu.memory_space<vmem>>, vector<1x128xf32>
    %cst_3 = arith.constant 7.812500e-03 : f32
    %5 = vector.broadcast %cst_3 : f32 to vector<1x128xf32>
    %6 = arith.mulf %4, %5 : vector<1x128xf32>
    %7 = arith.addf %0, %3 : vector<1x128xf32>
    %8 = arith.mulf %3, %3 : vector<1x128xf32>
    %9 = arith.subf %6, %8 : vector<1x128xf32>
    %cst_4 = arith.constant 9.99999974E-6 : f32
    %10 = vector.broadcast %cst_4 : f32 to vector<1x128xf32>
    %11 = arith.addf %9, %10 : vector<1x128xf32>
    %12 = math.rsqrt %11 : vector<1x128xf32>
    %c0_5 = arith.constant 0 : index
    %c0_6 = arith.constant 0 : index
    %13 = vector.load %arg3[%c0_5, %c0_6] : memref<1x128xf32, #tpu.memory_space<vmem>>, vector<1x128xf32>
    %14 = arith.mulf %12, %13 : vector<1x128xf32>
    %c0_7 = arith.constant 0 : index
    %c0_8 = arith.constant 0 : index
    %15 = vector.load %arg1[%c0_7, %c0_8] : memref<64x128xf32, #tpu.memory_space<vmem>>, vector<64x128xf32>
    %16 = vector.broadcast %7 : vector<1x128xf32> to vector<64x128xf32>
    %17 = arith.subf %15, %16 : vector<64x128xf32>
    %18 = vector.broadcast %14 : vector<1x128xf32> to vector<64x128xf32>
    %19 = arith.mulf %17, %18 : vector<64x128xf32>
    %c0_9 = arith.constant 0 : index
    %c0_10 = arith.constant 0 : index
    %20 = vector.load %arg4[%c0_9, %c0_10] : memref<1x128xf32, #tpu.memory_space<vmem>>, vector<1x128xf32>
    %21 = vector.broadcast %20 : vector<1x128xf32> to vector<64x128xf32>
    %22 = arith.addf %19, %21 : vector<64x128xf32>
    %c0_11 = arith.constant 0 : index
    %c0_12 = arith.constant 0 : index
    %23 = vector.load %arg5[%c0_11, %c0_12] : memref<64x128xf32, #tpu.memory_space<vmem>>, vector<64x128xf32>
    tpu.vector_store %arg5[%c0_11, %c0_12], %22 {strides = array<i32>} : memref<64x128xf32, #tpu.memory_space<vmem>>, vector<64x128xf32>,
    return
  }
  func.func @transform_0(%arg0: i32) -> (i32, i32) {
    %c0_i32 = arith.constant 0 : i32
    %c0_i32_0 = arith.constant 0 : i32
    return %arg0, %c0_i32 : i32, i32
  }
  func.func @transform_1(%arg0: i32) -> (i32, i32) {
    %c0_i32 = arith.constant 0 : i32
    %c0_i32_0 = arith.constant 0 : i32
    %c0_i32_1 = arith.constant 0 : i32
    return %c0_i32, %c0_i32_0 : i32, i32
  }
  func.func @transform_2(%arg0: i32) -> (i32, i32) {
    %c0_i32 = arith.constant 0 : i32
    %c0_i32_0 = arith.constant 0 : i32
    %c0_i32_1 = arith.constant 0 : i32
    return %c0_i32, %c0_i32_0 : i32, i32
  }
  func.func @transform_3(%arg0: i32) -> (i32, i32) {
    %c0_i32 = arith.constant 0 : i32
    %c0_i32_0 = arith.constant 0 : i32
    %c0_i32_1 = arith.constant 0 : i32
    return %c0_i32, %c0_i32_0 : i32, i32
  }
  func.func @transform_4(%arg0: i32) -> (i32, i32) {
    %c0_i32 = arith.constant 0 : i32
    %c0_i32_0 = arith.constant 0 : i32
    return %arg0, %c0_i32 : i32, i32
  }
}

</mosaic_0001>

<bundles_post_ra>
// kernel: encoder_block.3
= control target key start
LH: loop header
LB: loop body
LE: loop exit
PB: predicated region body
PF: predicated region fallthrough
CT: control target
= control target key end

     0   :  { %s379_s15 = smov 0   ;;  %s418_s0 = inlined_call_operand.vmem [shape: f32[128,128], index: 0, kind: input, shape index: {}]   ;;  %s419_s1 = inlined_call_operand.vmem [shape: f32[8,128], index: 1, kind: input, shape index: {}]   ;;  %s420_s2 = inlined_call_operand.vmem [shape: f32[1,128], index: 2, kind: input, shape index: {}]   ;;  %s421_s3 = inlined_call_operand.vmem [shape: f32[1,128], index: 3, kind: input, shape index: {}]   ;;  %s422_s4 = inlined_call_operand.vmem [shape: f32[128,128], index: 4, kind: output, shape index: {}]  }
   0x1 LB: > { %s324_s16 = sadd.s32 4294967295, %s352_s15   ;;  %p328_p0 = scmp.ge.s32.totalorder %s352_s15, 1  ;;  %s352_s15 = sphi %s379_s15, %s14_s15  }
   0x2   : > { %p163_p1 = scmp.lt.s32.totalorder %s352_s15, 3 }
   0x4   : > { %p164_p2 = pnand %p328_p0, %p163_p1 }
   0x5   : > { %s329_s21 = sshll.u32 (!%p164_p2), %s324_s16, 3 }
   0x6   : > { %167 = sbr.rel (%p164_p2) target bundleno = 46 (0x2e), region = 36  ;;  %p190_p3 = scmp.lt.s32.totalorder (!%p164_p2), %s329_s21, 15 }
   0xb   : > { %v202_v0 = vld [vmem:[%s419_s1 + $0x1] sm:$0x1]  ;;  %v204_v2 = vld [vmem:[%s419_s1 + $0x2] sm:$0x1]  ;;  %v221_v6 = vlaneseq  ;;  %s424_s21 = smov (!%p190_p3, %s329_s21), 15 }
   0xc   : > { %v203_v1 = vmul.f32 0.0078125, %v202_v0  ;;  %v205_v3 = vmul.f32 0.0078125, %v204_v2  ;;  %v201_v9 = vld [vmem:[%s419_s1] sm:$0x1]  ;;  %s330_s24 = sshll.u32 %s424_s21, 3 }
   0xd   : > { %v222_v8 = vshrl.u32 %v221_v6, 7  ;;  %s193_s27 = scalar_lea.vmem %s418_s0, %s330_s24  ;;  %v211_v13 = vld [vmem:[%s420_s2] sm:$0x1]  ;;  %s199_s8 = scalar_lea.vmem %s422_s4, %s330_s24 }
   0xe   : > { %v207_v4 = vmul.f32 %v203_v1, %v203_v1  ;;  %v206_v10 = vadd.f32 %v203_v1, %v201_v9  ;;  %v213_v14 = vld [vmem:[%s193_s27] sm:$0xff]  ;;  %v214_v15 = vld [vmem:[%s193_s27 + $0x8] sm:$0xff]  ;;  %v215_v16 = vld [vmem:[%s193_s27 + $0x10] sm:$0xff] }
   0xf   : > { %v223_v11 = vsub.s32 0, %v222_v8  ;;  %v216_v17 = vld [vmem:[%s193_s27 + $0x18] sm:$0xff]  ;;  %v217_v18 = vld [vmem:[%s193_s27 + $0x20] sm:$0xff]  ;;  %v218_v19 = vld [vmem:[%s193_s27 + $0x28] sm:$0xff] }
  0x10   : > { %v208_v5 = vsub.f32 %v205_v3, %v207_v4  ;;  %v219_v20 = vld [vmem:[%s193_s27 + $0x30] sm:$0xff]  ;;  %v220_v21 = vld [vmem:[%s193_s27 + $0x38] sm:$0xff]  ;;  %v333_v33 = vld [vmem:[%s421_s3] ss:$0 sm:$0xff] }
  0x11   : > { %v224_v12 = vrot.slane %v206_v10, %v223_v11 }
  0x12   : > { %v209_v7 = vadd.f32 1e-05, %v208_v5 }
  0x13   : > { %v225_v23 = vsub.f32 %v213_v14, %v224_v12  ;;  %v226_v25 = vsub.f32 %v214_v15, %v224_v12  ;;  %v227_v26 = vsub.f32 %v215_v16, %v224_v12  ;;  %v228_v27 = vsub.f32 %v216_v17, %v224_v12 }
  0x14   : > { %344 = vrsqrt.f32 %v209_v7  ;;  %v229_v28 = vsub.f32 %v217_v18, %v224_v12  ;;  %v230_v29 = vsub.f32 %v218_v19, %v224_v12  ;;  %v231_v30 = vsub.f32 %v219_v20, %v224_v12 }
  0x15   : > { %v232_v31 = vsub.f32 %v220_v21, %v224_v12 }
  0x21   : > { %v345_v22 = vpop.eup %344 }
  0x22   : > { %v212_v24 = vmul.f32 %v345_v22, %v211_v13 }
  0x24   : > { %v236_v32 = vrot.slane %v212_v24, %v223_v11 }
  0x26   : > { %v237_v34 = vmul.f32 %v236_v32, %v225_v23  ;;  %v238_v35 = vmul.f32 %v236_v32, %v226_v25  ;;  %v239_v36 = vmul.f32 %v236_v32, %v227_v26  ;;  %v240_v37 = vmul.f32 %v236_v32, %v228_v27 }
  0x27   : > { %v241_v38 = vmul.f32 %v236_v32, %v229_v28  ;;  %v242_v39 = vmul.f32 %v236_v32, %v230_v29  ;;  %v243_v40 = vmul.f32 %v236_v32, %v231_v30  ;;  %v244_v41 = vmul.f32 %v236_v32, %v232_v31 }
  0x28   : > { %v252_v42 = vadd.f32 %v333_v33, %v237_v34  ;;  %v253_v43 = vadd.f32 %v333_v33, %v238_v35  ;;  %v254_v44 = vadd.f32 %v333_v33, %v239_v36  ;;  %v255_v45 = vadd.f32 %v333_v33, %v240_v37 }
  0x29   : > { %v256_v46 = vadd.f32 %v333_v33, %v241_v38  ;;  %v257_v47 = vadd.f32 %v333_v33, %v242_v39  ;;  %v258_v48 = vadd.f32 %v333_v33, %v243_v40  ;;  %v259_v49 = vadd.f32 %v333_v33, %v244_v41 }
  0x2a   : > { %260 = vst [vmem:[%s199_s8] sm:$0xff] %v252_v42  ;;  %261 = vst [vmem:[%s199_s8 + $0x8] sm:$0xff] %v253_v43 }
  0x2b   : > { %262 = vst [vmem:[%s199_s8 + $0x10] sm:$0xff] %v254_v44  ;;  %263 = vst [vmem:[%s199_s8 + $0x18] sm:$0xff] %v255_v45 }
  0x2c   : > { %264 = vst [vmem:[%s199_s8 + $0x20] sm:$0xff] %v256_v46  ;;  %265 = vst [vmem:[%s199_s8 + $0x28] sm:$0xff] %v257_v47 }
  0x2d   : > { %266 = vst [vmem:[%s199_s8 + $0x30] sm:$0xff] %v258_v48  ;;  %267 = vst [vmem:[%s199_s8 + $0x38] sm:$0xff] %v259_v49 }
  0x2e PF: > { %s14_s15 = sadd.s32 1, %s352_s15  }
  0x2f   : > { %p11_p4 = scmp.ge.s32.totalorder %s14_s15, 4  }
  0x31   :  { %13 = sbr.rel (!%p11_p4) target bundleno = 1 (0x1), region = 66 }

// kernel: encoder_block.2
= control target key start
LH: loop header
LB: loop body
LE: loop exit
PB: predicated region body
PF: predicated region fallthrough
CT: control target
= control target key end

     0   :  { %s642_s12 = smov 0   ;;  %s727_s0 = inlined_call_operand.vmem [shape: bf16[128,128], index: 0, kind: input, shape index: {}]   ;;  %s728_s1 = inlined_call_operand.vmem [shape: bf16[128,128], index: 1, kind: input, shape index: {}]   ;;  %s729_s2 = inlined_call_operand.vmem [shape: f32[128,128], index: 2, kind: output, shape index: {0}]   ;;  %s730_s3 = inlined_call_operand.vmem [shape: f32[8,128], index: 3, kind: output, shape index: {1}]  }
   0x1 LB: > { %s648_s13 = sadd.s32 4294967295, %s619_s12   ;;  %p518_p0 = scmp.ge.s32.totalorder %s619_s12, 1  ;;  %s619_s12 = sphi %s642_s12, %s14_s12  }
   0x2   : > { %p136_p1 = scmp.lt.s32.totalorder %s619_s12, 3 }
   0x4   : > { %p137_p2 = pnand %p518_p0, %p136_p1 }
   0x5   : > { %s519_s16 = sshll.u32 (!%p137_p2), %s648_s13, 3  ;;  %p535_p4 = scmp.ne.s32.totalorder (!%p137_p2), %s648_s13, 0 }
   0x6   : > { %140 = sbr.rel (%p137_p2) target bundleno = 290 (0x122), region = 28  ;;  %p161_p3 = scmp.lt.s32.totalorder (!%p137_p2), %s519_s16, 15 }
   0xb   : > { %v601_v0 = vld [vmem:[%s728_s1 + $0x38] sm:$0xff]   ;;  %v602_v1 = vld [vmem:[%s728_s1 + $0x30] sm:$0xff]   ;;  %s732_s16 = smov (!%p161_p3, %s519_s16), 15  ;;  %v603_v2 = vld [vmem:[%s728_s1 + $0x28] sm:$0xff]  }
   0xc   : > { %552 = vmatprep.subr.bf16.mxu0 %v601_v0  ;;  %576 = vmatprep.subr.bf16.mxu1 %v601_v0  ;;  %s520_s21 = sshll.u32 %s732_s16, 2  ;;  %v604_v3 = vld [vmem:[%s728_s1 + $0x20] sm:$0xff]   ;;  %v605_v6 = vld [vmem:[%s728_s1 + $0x18] sm:$0xff]   ;;  %v606_v7 = vld [vmem:[%s728_s1 + $0x10] sm:$0xff]   ;;  %s522_s8 = sshll.u32 %s732_s16, 3 }
   0xd   : > { %553 = vmatpush3.bf16.msra.mxu0 %v601_v0  ;;  %584 = vmatpush3.bf16.msra.mxu1 %v601_v0  ;;  %s668_s24 = scalar_lea.vmem %s727_s0, %s520_s21  ;;  %v607_v8 = vld [vmem:[%s728_s1 + $0x8] sm:$0xff]   ;;  %v608_v9 = vld [vmem:[%s728_s1] sm:$0xff]   ;;  %s170_s11 = scalar_lea.vmem %s729_s2, %s522_s8 }
   0xe   : > { %554 = vmatprep.subr.bf16.mxu0 %v602_v1  ;;  %577 = vmatprep.subr.bf16.mxu1 %v602_v1  ;;  %v609_v4 = vld [vmem:[%s668_s24] sm:$0xff]   ;;  %v610_v5 = vld [vmem:[%s668_s24 + $0x10] sm:$0xff]   ;;  %v611_v10 = vld [vmem:[%s668_s24 + $0x8] sm:$0xff]  }
   0xf   : > { %568 = vmatprep.mubr.bf16.mxu0 %v609_v4  ;;  %572 = vmatprep.mubr.bf16.mxu1 %v610_v5  ;;  %v612_v11 = vld [vmem:[%s668_s24 + $0x18] sm:$0xff]  }
  0x11   : > { %555 = vmatpush3.bf16.msra.mxu0 %v602_v1  ;;  %585 = vmatpush3.bf16.msra.mxu1 %v602_v1 }
  0x12   : > { %556 = vmatprep.subr.bf16.mxu0 %v603_v2  ;;  %578 = vmatprep.subr.bf16.mxu1 %v603_v2 }
  0x15   : > { %557 = vmatpush3.bf16.msra.mxu0 %v603_v2  ;;  %586 = vmatpush3.bf16.msra.mxu1 %v603_v2 }
  0x16   : > { %558 = vmatprep.subr.bf16.mxu0 %v604_v3  ;;  %579 = vmatprep.subr.bf16.mxu1 %v604_v3 }
  0x19   : > { %559 = vmatpush3.bf16.msra.mxu0 %v604_v3  ;;  %587 = vmatpush3.bf16.msra.mxu1 %v604_v3 }
  0x1a   : > { %560 = vmatprep.subr.bf16.mxu0 %v605_v6  ;;  %580 = vmatprep.subr.bf16.mxu1 %v605_v6 }
  0x1d   : > { %561 = vmatpush3.bf16.msra.mxu0 %v605_v6  ;;  %588 = vmatpush3.bf16.msra.mxu1 %v605_v6 }
  0x1e   : > { %562 = vmatprep.subr.bf16.mxu0 %v606_v7  ;;  %581 = vmatprep.subr.bf16.mxu1 %v606_v7 }
  0x21   : > { %563 = vmatpush3.bf16.msra.mxu0 %v606_v7  ;;  %589 = vmatpush3.bf16.msra.mxu1 %v606_v7 }
  0x22   : > { %564 = vmatprep.subr.bf16.mxu0 %v607_v8  ;;  %582 = vmatprep.subr.bf16.mxu1 %v607_v8 }
  0x25   : > { %565 = vmatpush3.bf16.msra.mxu0 %v607_v8  ;;  %590 = vmatpush3.bf16.msra.mxu1 %v607_v8 }
  0x26   : > { %566 = vmatprep.subr.bf16.mxu0 %v608_v9  ;;  %583 = vmatprep.subr.bf16.mxu1 %v608_v9 }
  0x29   : > { %567 = vmatpush3.bf16.msra.mxu0 %v608_v9  ;;  %591 = vmatpush3.bf16.msra.mxu1 %v608_v9 }
  0x2c   : > { %569 = vmatmul.mubr.bf16.vlgmr.msra.gmra.mxu0 %v611_v10  ;;  %573 = vmatmul.mubr.bf16.vlgmr.msra.gmra.mxu1 %v612_v11 }
  0xec   : > { %v570_v12 = vpop.f32.mrf.mxu0  ;;  %v693_v13 = vpop.f32.mrf.mxu1 }
  0xed   : > { %336 = vst [vmem:[%s170_s11 + $0x10] sm:$0xff] %v570_v12  ;;  %340 = vst [vmem:[%s170_s11 + $0x30] sm:$0xff] %v693_v13 }
  0xee   : > { %v303_v14 = vpop.f32.mrf.mxu0  ;;  %v319_v15 = vpop.f32.mrf.mxu1 }
  0xef   : > { %334 = vst [vmem:[%s170_s11] sm:$0xff] %v303_v14  ;;  %338 = vst [vmem:[%s170_s11 + $0x20] sm:$0xff] %v319_v15  ;;  %345 = sbr.rel (%p535_p4) target bundleno = 247 (0xf7), region = 32 }
  0xf0   : > { %v571_v16 = vpop.f32.mrf.mxu0  ;;  %v696_v17 = vpop.f32.mrf.mxu1 }
  0xf1   : > { %337 = vst [vmem:[%s170_s11 + $0x18] sm:$0xff] %v571_v16  ;;  %341 = vst [vmem:[%s170_s11 + $0x38] sm:$0xff] %v696_v17 }
  0xf2   : > { %v306_v18 = vpop.f32.mrf.mxu0  ;;  %v322_v19 = vpop.f32.mrf.mxu1 }
  0xf3   : > { %335 = vst [vmem:[%s170_s11 + $0x8] sm:$0xff] %v306_v18  ;;  %339 = vst [vmem:[%s170_s11 + $0x28] sm:$0xff] %v322_v19 }
  0xf4   : > { %v621_v20 = vmov 0.0  }
  0xf5   : > { %346 = vst [vmem:[%s730_s3] sm:$0xff] %v621_v20 }
  0xf6   : > { %347 = vst [vmem:[%s730_s3] sm:$0x1] %v303_v14 }
  0xf7 PF: > { %v349_v22 = vlaneseq  ;;  %s536_s20 = sshll.u32 %s648_s13, 6 }
  0xf8   : > { %v359_v24 = vstv %s536_s20 }
  0xf9   : > { %v350_v23 = vshrl.u32 %v349_v22, 7 }
  0xfb   : > { %v351_v27 = vadd.s32 8, %v350_v23  ;;  %v352_v28 = vadd.s32 16, %v350_v23  ;;  %v353_v29 = vadd.s32 24, %v350_v23  ;;  %v354_v30 = vadd.s32 32, %v350_v23 }
  0xfc   : > { %v355_v31 = vadd.s32 40, %v350_v23  ;;  %v356_v32 = vadd.s32 48, %v350_v23  ;;  %v360_v33 = vadd.s32 %v359_v24, %v350_v23  ;;  %v357_v39 = vadd.s32 56, %v350_v23  ;;  %v412_v22 = vld [vmem:[%s730_s3 + $0x1] sm:$0x1] }
  0xfd   : > { %v537_v21 = vld [vmem:[%s730_s3] ss:$0 sm:$0xff]  ;;  %v361_v35 = vadd.s32 %v359_v24, %v351_v27  ;;  %v362_v36 = vadd.s32 %v359_v24, %v352_v28  ;;  %v363_v37 = vadd.s32 %v359_v24, %v353_v29  ;;  %v364_v38 = vadd.s32 %v359_v24, %v354_v30  ;;  %v428_v27 = vld [vmem:[%s730_s3 + $0x2] sm:$0x1] }
  0xfe   : > { %v380_v25 = vsub.f32 %v303_v14, %v537_v21  ;;  %v381_v26 = vsub.f32 %v306_v18, %v537_v21  ;;  %v382_v34 = vsub.f32 %v570_v12, %v537_v21  ;;  %vm368_vm0 = vcmp.lt.s32.totalorder %v360_v33, 128 }
  0xff   : > { %v383_v40 = vsub.f32 %v571_v16, %v537_v21  ;;  %v365_v41 = vadd.s32 %v359_v24, %v355_v31  ;;  %vm369_vm1 = vcmp.lt.s32.totalorder %v361_v35, 128  ;;  %vm370_vm2 = vcmp.lt.s32.totalorder %v362_v36, 128 }
 0x100   : > { %vm371_vm3 = vcmp.lt.s32.totalorder %v363_v37, 128  ;;  %v384_v42 = vsub.f32 %v319_v15, %v537_v21  ;;  %v404_v43 = vsel %vm368_vm0, %v380_v25, 0.0  ;;  %v366_v44 = vadd.s32 %v359_v24, %v356_v32 }
 0x101   : > { %vm372_vm4 = vcmp.lt.s32.totalorder %v364_v38, 128  ;;  %v405_v45 = vsel %vm369_vm1, %v381_v26, 0.0  ;;  %v406_v46 = vsel %vm370_vm2, %v382_v34, 0.0  ;;  %v367_v47 = vadd.s32 %v359_v24, %v357_v39 }
 0x102   : > { %v385_v48 = vsub.f32 %v322_v19, %v537_v21  ;;  %v407_v49 = vsel %vm371_vm3, %v383_v40, 0.0  ;;  %v413_v50 = vadd.f32 %v405_v45, %v404_v43  ;;  %vm373_vm5 = vcmp.lt.s32.totalorder %v365_v41, 128 }
 0x103   : > { %v429_v51 = vmul.f32 %v404_v43, %v404_v43  ;;  %v430_v52 = vmul.f32 %v405_v45, %v405_v45  ;;  %v431_v53 = vmul.f32 %v406_v46, %v406_v46  ;;  %v386_v54 = vsub.f32 %v693_v13, %v537_v21 }
 0x104   : > { %v408_v55 = vsel %vm372_vm4, %v384_v42, 0.0  ;;  %v414_v56 = vadd.f32 %v413_v50, %v406_v46  ;;  %vm374_vm6 = vcmp.lt.s32.totalorder %v366_v44, 128  ;;  %v432_v57 = vmul.f32 %v407_v49, %v407_v49 }
 0x105   : > { %v437_v58 = vadd.f32 %v430_v52, %v429_v51  ;;  %v387_v59 = vsub.f32 %v696_v17, %v537_v21  ;;  %v409_v60 = vsel %vm373_vm5, %v385_v48, 0.0  ;;  %vm375_vm7 = vcmp.lt.s32.totalorder %v367_v47, 128 }
 0x106   : > { %v415_v61 = vadd.f32 %v414_v56, %v407_v49  ;;  %v433_v62 = vmul.f32 %v408_v55, %v408_v55  ;;  %v410_v0 = vsel %vm374_vm6, %v386_v54, 0.0  ;;  %v434_v2 = vmul.f32 %v409_v60, %v409_v60 }
 0x107   : > { %v438_v63 = vadd.f32 %v437_v58, %v431_v53  ;;  %v411_v4 = vsel %vm375_vm7, %v387_v59, 0.0  ;;  %v435_v6 = vmul.f32 %v410_v0, %v410_v0 }
 0x108   : > { %v416_v1 = vadd.f32 %v415_v61, %v408_v55  ;;  %v436_v9 = vmul.f32 %v411_v4, %v411_v4 }
 0x109   : > { %v439_v3 = vadd.f32 %v438_v63, %v432_v57 }
 0x10a   : > { %v417_v5 = vadd.f32 %v416_v1, %v409_v60 }
 0x10b   : > { %v440_v7 = vadd.f32 %v439_v3, %v433_v62 }
 0x10c   : > { %v418_v8 = vadd.f32 %v417_v5, %v410_v0 }
 0x10d   : > { %v441_v10 = vadd.f32 %v440_v7, %v434_v2 }
 0x10e   : > { %v419_v11 = vadd.f32 %v418_v8, %v411_v4 }
 0x10f   : > { %v442_v12 = vadd.f32 %v441_v10, %v435_v6 }
 0x110   : > { %v420_v13 = vrot.slane %v419_v11, 4 }
 0x111   : > { %v443_v14 = vadd.f32 %v442_v12, %v436_v9 }
 0x112   : > { %v421_v15 = vadd.f32 %v420_v13, %v419_v11 }
 0x113   : > { %v444_v16 = vrot.slane %v443_v14, 4 }
 0x114   : > { %v422_v17 = vrot.slane %v421_v15, 2 }
 0x115   : > { %v445_v18 = vadd.f32 %v444_v16, %v443_v14 }
 0x116   : > { %v423_v19 = vadd.f32 %v422_v17, %v421_v15 }
 0x117   : > { %v446_v20 = vrot.slane %v445_v18, 2 }
 0x118   : > { %v424_v21 = vrot.slane %v423_v19, 1 }
 0x119   : > { %v447_v23 = vadd.f32 %v446_v20, %v445_v18 }
 0x11a   : > { %v425_v24 = vadd.f32 %v424_v21, %v423_v19 }
 0x11b   : > { %v448_v25 = vrot.slane %v447_v23, 1 }
 0x11c   : > { %v426_v26 = vadd.f32 %v425_v24, %v412_v22 }
 0x11d   : > { %v449_v28 = vadd.f32 %v448_v25, %v447_v23 }
 0x11e   : > { %427 = vst [vmem:[%s730_s3 + $0x1] sm:$0x1] %v426_v26 }
 0x11f   : > { %v450_v29 = vadd.f32 %v449_v28, %v428_v27 }
 0x121   : > { %451 = vst [vmem:[%s730_s3 + $0x2] sm:$0x1] %v450_v29 }
 0x122 PF: > { %s14_s12 = sadd.s32 1, %s619_s12  }
 0x123   : > { %p11_p5 = scmp.ge.s32.totalorder %s14_s12, 4  }
 0x125   :  { %13 = sbr.rel (!%p11_p5) target bundleno = 1 (0x1), region = 70 }

</bundles_post_ra>
